<compile_context>
chip_gen: v7x
topology: tpu7x:2x2x1
jax: 0.10.0
libtpu: 0.0.40
codegen_flags: <defaults>
</compile_context>

<pallas_src>
import jax
import jax.numpy as jnp
from jax.experimental import pallas as pl
from jax.experimental.pallas import tpu as pltpu

_VMEM_BUDGET = 32 << 20   # double-buffered block bytes across all 4 streams


def _cdiv(a: int, b: int) -> int:
    return -(-a // b)


def _round_up(x: int, m: int) -> int:
    return _cdiv(x, m) * m


def _sublane_mult(*dtypes) -> int:
    # Native sublane tile per dtype width: f32 -> 8, bf16 -> 16, int8/fp8 -> 32.
    return max(8 * max(1, 4 // jnp.dtype(d).itemsize) for d in dtypes)


def _cross_gating_kernel(x1_ref, x2_ref, o1_ref, o2_ref):
    dt = o1_ref.dtype
    x1 = x1_ref[...].astype(dt)          # in-kernel cast (free under DMA)
    x2 = x2_ref[...].astype(dt)
    x1_out = jnp.maximum(x1, 0.0) * x2            # relu(x1) * x2
    o1_ref[...] = x1_out
    o2_ref[...] = jnp.maximum(x2, 0.0) * x1_out   # relu(x2) * updated x1


def cross_gating(x1: jax.Array, x2: jax.Array):
    """CrossGating forward. x1: (N, dim1), x2: (N, dim2) with dim1 == dim2."""
    assert x1.shape == x2.shape, "forward requires dim1 == dim2 (elementwise mul)"
    orig_shape = x1.shape
    out_dtype = jnp.result_type(x1.dtype, x2.dtype)

    total = x1.size
    i1 = jnp.dtype(x1.dtype).itemsize
    i2 = jnp.dtype(x2.dtype).itemsize
    io = jnp.dtype(out_dtype).itemsize
    step_bpe = i1 + i2 + 2 * io                      # HBM bytes / element / step
    sub_mult = _sublane_mult(x1.dtype, x2.dtype, out_dtype)

    # ---- pad-free lane-dense view ------------------------------------------
    lane_w = None
    for cand in (1024, 512, 256, 128):
        if total % cand == 0:
            lane_w = cand
            break
    if lane_w is None:
        # Natural trailing dim: no padding / slicing passes; stores may be
        # lane-masked but we never double HBM traffic on odd shapes.
        lane_w = orig_shape[-1] if x1.ndim >= 2 else total
    rows = total // lane_w

    x1v = x1.reshape(rows, lane_w)
    x2v = x2.reshape(rows, lane_w)

    # ---- block-row / grid plan ---------------------------------------------
    max_block_elems = max(lane_w * sub_mult, _VMEM_BUDGET // (2 * step_bpe))
    cap_rows = max(sub_mult, (max_block_elems // lane_w) // sub_mult * sub_mult)

    if rows <= cap_rows:
        block_rows, grid_rows = rows, 1
        # Split sizeable single blocks in two so the parallel axis can shard
        # across v7x's two TensorCores (one extra ~0.35us step elsewhere).
        if rows >= 2 * sub_mult and rows * lane_w * step_bpe >= (4 << 20):
            block_rows = _round_up(_cdiv(rows, 2), sub_mult)
            grid_rows = _cdiv(rows, block_rows)
    else:
        block_rows = cap_rows
        grid_rows = _cdiv(rows, block_rows)
        if grid_rows % 2 == 1:
            # Best effort: even step count for v7x megacore load balance.
            br = _round_up(_cdiv(rows, grid_rows + 1), sub_mult)
            g = _cdiv(rows, br)
            if g % 2 == 0:
                block_rows, grid_rows = br, g

    spec = pl.BlockSpec((block_rows, lane_w), lambda i: (i, 0))
    out_sds = jax.ShapeDtypeStruct((rows, lane_w), out_dtype)

    needed_vmem = 2 * block_rows * lane_w * step_bpe   # 4 streams, 2-deep
    vmem_limit = min(56 << 20, max(needed_vmem + (2 << 20), 32 << 20))

    o1, o2 = pl.pallas_call(
        _cross_gating_kernel,
        out_shape=(out_sds, out_sds),
        grid_spec=pl.GridSpec(
            grid=(grid_rows,),
            in_specs=[spec, spec],
            out_specs=[spec, spec],
        ),
        compiler_params=pltpu.CompilerParams(
            dimension_semantics=("parallel",),
            vmem_limit_bytes=vmem_limit,
        ),
        cost_estimate=pl.CostEstimate(
            flops=4 * total,                 # 2 max + 2 mul per element
            transcendentals=0,
            bytes_accessed=total * step_bpe,
        ),
    )(x1v, x2v)

    return o1.reshape(orig_shape), o2.reshape(orig_shape)


def init_cross_gating_params(key, dim1: int, dim2: int):
    """Init of the (unused-in-forward) Linear params, matching nn.Linear shapes."""
    k1, k2, k3, k4 = jax.random.split(key, 4)
    b1 = 1.0 / (dim1 ** 0.5)
    b2 = 1.0 / (dim2 ** 0.5)
    return {
        "linear1": {
            "weight": jax.random.uniform(k1, (dim2, dim1), jnp.float32, -b1, b1),
            "bias": jax.random.uniform(k2, (dim2,), jnp.float32, -b1, b1),
        },
        "linear2": {
            "weight": jax.random.uniform(k3, (dim1, dim2), jnp.float32, -b2, b2),
            "bias": jax.random.uniform(k4, (dim1,), jnp.float32, -b2, b2),
        },
    }


def _ref(x1, x2):
    r1 = jnp.maximum(x1, 0.0) * x2
    r2 = jnp.maximum(x2, 0.0) * r1
    return r1, r2


if __name__ == "__main__":
    key = jax.random.PRNGKey(0)
    kp, kx1, kx2, ky1, ky2, kz1, kz2, kw1, kw2, km2 = jax.random.split(key, 10)

    # Small primary example consistent with the module: N rows, dim1 == dim2.
    N, dim1, dim2 = 8, 32, 32
    params = init_cross_gating_params(kp, dim1, dim2)  # defined but unused in forward

    x1 = jax.random.normal(kx1, (N, dim1), dtype=jnp.float32)
    x2 = jax.random.normal(kx2, (N, dim2), dtype=jnp.float32)
    o1, o2 = cross_gating(x1, x2)
    jax.block_until_ready((o1, o2))
    r1, r2 = _ref(x1, x2)
    assert o1.shape == (N, dim1) and o2.shape == (N, dim2)
    assert jnp.allclose(o1, r1, atol=1e-6), "x1 output mismatch (small f32)"
    assert jnp.allclose(o2, r2, atol=1e-6), "x2 output mismatch (small f32)"

    # Medium f32: single-block-sized data split into an even 2-step grid.
    y1 = jax.random.normal(ky1, (512, 1024), dtype=jnp.float32)
    y2 = jax.random.normal(ky2, (512, 1024), dtype=jnp.float32)
    p1, p2 = cross_gating(y1, y2)
    jax.block_until_ready((p1, p2))
    q1, q2 = _ref(y1, y2)
    assert jnp.allclose(p1, q1, atol=1e-6) and jnp.allclose(p2, q2, atol=1e-6), \
        "mismatch (medium f32)"

    # Larger f32: multi-block grid with odd->even adjustment + partial last block.
    w1 = jax.random.normal(kw1, (2600, 1024), dtype=jnp.float32)
    w2 = jax.random.normal(kw2, (2600, 1024), dtype=jnp.float32)
    a1, a2 = cross_gating(w1, w2)
    jax.block_until_ready((a1, a2))
    b1, b2 = _ref(w1, w2)
    assert jnp.allclose(a1, b1, atol=1e-6) and jnp.allclose(a2, b2, atol=1e-6), \
        "mismatch (tiled f32, partial block)"

    # Odd bf16 shape: natural (non-128-multiple) lanes, no padding passes.
    z1 = jax.random.normal(kz1, (37, 50), dtype=jnp.bfloat16)
    z2 = jax.random.normal(kz2, (37, 50), dtype=jnp.bfloat16)
    u1, u2 = cross_gating(z1, z2)
    jax.block_until_ready((u1, u2))
    v1, v2 = _ref(z1, z2)
    assert jnp.allclose(u1.astype(jnp.float32), v1.astype(jnp.float32), atol=2e-2), \
        "mismatch (bf16 x1)"
    assert jnp.allclose(u2.astype(jnp.float32), v2.astype(jnp.float32), atol=2e-2), \
        "mismatch (bf16 x2)"

    # Mixed dtypes: bf16 input is cast inside the kernel, output is f32.
    m2 = jax.random.normal(km2, (N, dim2), dtype=jnp.bfloat16)
    c1, c2 = cross_gating(x1, m2)
    jax.block_until_ready((c1, c2))
    d1, d2 = _ref(x1, m2)
    assert c1.dtype == jnp.float32 and c2.dtype == jnp.float32
    assert jnp.allclose(c1, d1, atol=1e-6) and jnp.allclose(c2, d2, atol=1e-6), \
        "mismatch (mixed dtype)"

    print("KERNEL_OK")
</pallas_src>

<mosaic_0001>
module attributes {stable_mosaic.version = 11 : i64} {
  func.func @_cross_gating_kernel(%arg0: i32, %arg1: memref<1x256xf32, #tpu.memory_space<vmem>>, %arg2: memref<1x256xf32, #tpu.memory_space<vmem>>, %arg3: memref<1x256xf32, #tpu.memory_space<vmem>>, %arg4: memref<1x256xf32, #tpu.memory_space<vmem>>) attributes {dimension_semantics = [#tpu.dimension_semantics<parallel>], iteration_bounds = array<i64: 1>, scalar_prefetch = 0 : i64, scratch_operands = 0 : i64, tpu.core_type = #tpu.core_type<tc>, window_params = [{transform_indices = @transform_0, window_bounds = array<i64: 1, 256>}, {transform_indices = @transform_1, window_bounds = array<i64: 1, 256>}, {transform_indices = @transform_2, window_bounds = array<i64: 1, 256>}, {transform_indices = @transform_3, window_bounds = array<i64: 1, 256>}]} {
    %c0 = arith.constant 0 : index
    %c0_0 = arith.constant 0 : index
    %0 = vector.load %arg1[%c0, %c0_0] : memref<1x256xf32, #tpu.memory_space<vmem>>, vector<1x256xf32>
    %c0_1 = arith.constant 0 : index
    %c0_2 = arith.constant 0 : index
    %1 = vector.load %arg2[%c0_1, %c0_2] : memref<1x256xf32, #tpu.memory_space<vmem>>, vector<1x256xf32>
    %cst = arith.constant 0.000000e+00 : f32
    %2 = vector.broadcast %cst : f32 to vector<1x256xf32>
    %3 = arith.maximumf %0, %2 : vector<1x256xf32>
    %4 = arith.mulf %3, %1 : vector<1x256xf32>
    %c0_3 = arith.constant 0 : index
    %c0_4 = arith.constant 0 : index
    %5 = vector.load %arg3[%c0_3, %c0_4] : memref<1x256xf32, #tpu.memory_space<vmem>>, vector<1x256xf32>
    tpu.vector_store %arg3[%c0_3, %c0_4], %4 {strides = array<i32>} : memref<1x256xf32, #tpu.memory_space<vmem>>, vector<1x256xf32>,
    %cst_5 = arith.constant 0.000000e+00 : f32
    %6 = vector.broadcast %cst_5 : f32 to vector<1x256xf32>
    %7 = arith.maximumf %1, %6 : vector<1x256xf32>
    %8 = arith.mulf %7, %4 : vector<1x256xf32>
    %c0_6 = arith.constant 0 : index
    %c0_7 = arith.constant 0 : index
    %9 = vector.load %arg4[%c0_6, %c0_7] : memref<1x256xf32, #tpu.memory_space<vmem>>, vector<1x256xf32>
    tpu.vector_store %arg4[%c0_6, %c0_7], %8 {strides = array<i32>} : memref<1x256xf32, #tpu.memory_space<vmem>>, vector<1x256xf32>,
    return
  }
  func.func @transform_0(%arg0: i32) -> (i32, i32) {
    %c0_i32 = arith.constant 0 : i32
    %c0_i32_0 = arith.constant 0 : i32
    return %arg0, %c0_i32 : i32, i32
  }
  func.func @transform_1(%arg0: i32) -> (i32, i32) {
    %c0_i32 = arith.constant 0 : i32
    %c0_i32_0 = arith.constant 0 : i32
    return %arg0, %c0_i32 : i32, i32
  }
  func.func @transform_2(%arg0: i32) -> (i32, i32) {
    %c0_i32 = arith.constant 0 : i32
    %c0_i32_0 = arith.constant 0 : i32
    return %arg0, %c0_i32 : i32, i32
  }
  func.func @transform_3(%arg0: i32) -> (i32, i32) {
    %c0_i32 = arith.constant 0 : i32
    %c0_i32_0 = arith.constant 0 : i32
    return %arg0, %c0_i32 : i32, i32
  }
}

</mosaic_0001>

<bundles_post_ra>
// kernel: tpu_custom_call.1
= control target key start
LH: loop header
LB: loop body
LE: loop exit
PB: predicated region body
PF: predicated region fallthrough
CT: control target
= control target key end

     0   :  { %9 = vsyncpa [#allocation3], 0  ;;  %s213_s0 = inlined_call_operand.hbm [shape: f32[1,256], index: 0, kind: input, shape index: {}]   ;;  %s214_s1 = inlined_call_operand.vmem [shape: f32[1,256], index: 1, kind: input, shape index: {}]   ;;  %s215_s2 = inlined_call_operand.hbm [shape: f32[1,256], index: 2, kind: output, shape index: {0}]   ;;  %s216_s3 = inlined_call_operand.hbm [shape: f32[1,256], index: 3, kind: output, shape index: {1}]  }
   0x1   :  { %10 = vsyncpa [#allocation4], 0 }
   0x2   :  { %11 = vsyncpa [#allocation7], 0  ;;  %s143_s12 = smov [#allocation2]   ;;  %s71_s16 = scalar_lea.hbm %s213_s0, 32 }
   0x3   :  { %s18_s13 = sshll.u32 %s143_s12, 4  ;;  %p72_p0 = scmp.ne.s32.totalorder %s213_s0, %s71_s16  ;;  %s19_s13 = int_to_ptr.vmem [resolvable:$true] %s18_s13 }
   0x4   :  { %p75_p1 = scmp.lt.u32.totalorder %s71_s16, %s213_s0 }
   0x6   :  { %p77_p2 = pnand %p75_p1, %p72_p0 }
   0x8   :  { %80 = shalt.err (!%p77_p2)
}
   0x9   :  { %s81_s21 = scalar_lea.vmem %s19_s13, 32  ;;  %p86_p4 = scmp.lt.s32.totalorder %s19_s13, %s19_s13 }
   0xa   :  { %p82_p3 = scmp.ne.s32.totalorder %s19_s13, %s81_s21  ;;  %p87_p5 = scmp.lt.s32.totalorder %s81_s21, %s81_s21 }
   0xc   :  { %p88_p6 = por %p87_p5, %p86_p4 }
   0xe   :  { %p89_p7 = pnand %p88_p6, %p82_p3 }
  0x10   :  { %92 = shalt.err (!%p89_p7)
}
  0x11   :  { %21 = dma.hbm_to_vmem [thread:$0]  %s213_s0, 32, %s19_s13, [#allocation3]  }
  0x12   :  { %137 = dma.done.wait [#allocation3], 32  }
  0x13   :  { %138 = vsyncadd [#allocation3], 4294967264  ;;  %v31_v0 = vlaneseq  ;;  %v27_v1 = vld [vmem:[#allocation2] sm:$0x3]  ;;  %s144_s26 = smov [#allocation5]   ;;  %s145_s28 = smov [#allocation6]  }
  0x14   :  { %v28_v2 = vld [vmem:[%s214_s1] sm:$0x3]  ;;  %s45_s27 = sshll.u32 %s144_s26, 4  ;;  %v29_v3 = vmax.f32 %v27_v1, 0.0  ;;  %s55_s29 = sshll.u32 %s145_s28, 4  ;;  %s46_s27 = int_to_ptr.vmem [resolvable:$true] %s45_s27  ;;  %s56_s29 = int_to_ptr.vmem [resolvable:$true] %s55_s29 }
  0x15   :  { %v36_v4 = vmax.f32 %v28_v2, 0.0  ;;  %vm181_vm0 = vcmp.lt.s32.totalorder %v31_v0, 256  ;;  %s93_s0 = scalar_lea.vmem %s46_s27, 32  ;;  %p98_p9 = scmp.lt.s32.totalorder %s46_s27, %s46_s27 }
  0x16   :  { %v30_v6 = vmul.f32 %v29_v3, %v28_v2  ;;  %p94_p8 = scmp.ne.s32.totalorder %s46_s27, %s93_s0  ;;  %p99_p10 = scmp.lt.s32.totalorder %s93_s0, %s93_s0 }
  0x18   :  { %35 = vst.msk [vmem:[#allocation5] sm:$0x3] %vm181_vm0, %v30_v6  ;;  %v37_v7 = vmul.f32 %v36_v4, %v30_v6  ;;  %p100_p11 = por %p99_p10, %p98_p9 }
  0x1a   :  { %p101_p12 = pnand %p100_p11, %p94_p8 }
  0x1c   :  { %104 = shalt.err (!%p101_p12)
}
  0x1d   :  { %s105_s4 = scalar_lea.hbm %s215_s2, 32 }
  0x1e   :  { %p106_p13 = scmp.ne.s32.totalorder %s215_s2, %s105_s4  ;;  %p109_p0 = scmp.lt.u32.totalorder %s105_s4, %s215_s2 }
  0x20   :  { %p111_p1 = pnand %p109_p0, %p106_p13 }
  0x22   :  { %114 = shalt.err (!%p111_p1)
}
  0x23   :  { %48 = dma.vmem_to_hbm [thread:$0]  %s46_s27, 32, %s215_s2, [#allocation4]   ;;  %38 = vst.msk [vmem:[#allocation6] sm:$0x3] %vm181_vm0, %v37_v7 }
  0x24   :  { %s115_s11 = scalar_lea.vmem %s56_s29, 32  ;;  %p120_p3 = scmp.lt.s32.totalorder %s56_s29, %s56_s29 }
  0x25   :  { %p116_p2 = scmp.ne.s32.totalorder %s56_s29, %s115_s11  ;;  %p121_p4 = scmp.lt.s32.totalorder %s115_s11, %s115_s11 }
  0x27   :  { %p122_p5 = por %p121_p4, %p120_p3 }
  0x29   :  { %p123_p6 = pnand %p122_p5, %p116_p2 }
  0x2b   :  { %126 = shalt.err (!%p123_p6)
}
  0x2c   :  { %s127_s14 = scalar_lea.hbm %s216_s3, 32 }
  0x2d   :  { %p128_p7 = scmp.ne.s32.totalorder %s216_s3, %s127_s14  ;;  %p131_p8 = scmp.lt.u32.totalorder %s127_s14, %s216_s3 }
  0x2f   :  { %p133_p9 = pnand %p131_p8, %p128_p7 }
  0x31   :  { %136 = shalt.err (!%p133_p9)
}
  0x32   :  { %58 = dma.vmem_to_hbm [thread:$0]  %s56_s29, 32, %s216_s3, [#allocation7]  }
  0x33   :  { %139 = dma.done.wait [#allocation4], 32  }
  0x34   :  { %140 = vsyncadd [#allocation4], 4294967264 }
  0x35   :  { %141 = dma.done.wait [#allocation7], 32  }
  0x36   :  { %142 = vsyncadd [#allocation7], 4294967264 }
  0x37   :  { %65 = vsyncpa [#allocation3], 1 }
  0x38   :  { %66 = vsyncpa [#allocation4], 1 }
  0x39   :  { %67 = vsyncpa [#allocation7], 1 }

</bundles_post_ra>
